<compile_context>
chip_gen: v6e
topology: v6e:2x2x1
jax: 0.10.0
libtpu: 0.0.40
codegen_flags: <defaults>
</compile_context>

<pallas_src>
import functools

import jax
import jax.numpy as jnp
from jax.experimental import pallas as pl
from jax.experimental.pallas import tpu as pltpu

CPAD = 128   # packed conv-channel lanes (nk*C padded up; use 256 on v6e/v7x for big C)
NPAD = 128   # padded FC-output lanes (lane-dense logits store; sliced in wrapper)


# ---------------------------------------------------------------------------
# Fused kernel: DMA embedding gather + im2col conv + ReLU + masked max-pool + FC.
# One grid step handles TB batch elements (rows = TB*L tokens).
# ---------------------------------------------------------------------------
def textcnn_kernel(ids_ref,            # (B*L,) int32   scalar prefetch (SMEM)
                   emb_hbm,            # (vocab, E) f32 HBM (pl.ANY)
                   w_ref,              # (k_max*E, CPAD) bf16  im2col conv weights
                   b_ref,              # (1, CPAD) f32  packed conv bias
                   mask_ref,           # (L, CPAD) f32  1.0 valid pos / 0.0 masked
                   fcw_ref,            # (CPAD, NPAD) bf16  permuted+padded FC weight
                   fcb_ref,            # (1, NPAD) f32
                   o_ref,              # (TB, NPAD) f32
                   x_vmem,             # (TB*L + k_max - 1, E) f32 scratch
                   sem,                # (1,) DMA semaphore
                   *, TB, L, E, k_max):
    rows = TB * L
    base = pl.program_id(0) * rows
    cpad = w_ref.shape[1]

    # 1) Embedding lookup: per-token row DMA from HBM, ids read from SMEM.
    #    All copies share one semaphore; one matching wait per copy below.
    @pl.loop(0, rows)
    def _(r):
        tok = ids_ref[base + r]
        pltpu.make_async_copy(emb_hbm.at[pl.ds(tok, 1), :],
                              x_vmem.at[pl.ds(r, 1), :],
                              sem.at[0]).start()

    # Zero the k_max-1 tail pad rows (they are only touched by zero-weight
    # taps / masked positions, but must be finite — stale VMEM could be NaN).
    x_vmem[rows:rows + k_max - 1, :] = jnp.zeros((k_max - 1, E), jnp.float32)

    @pl.loop(0, rows)
    def _(r):
        pltpu.make_async_copy(emb_hbm.at[pl.ds(0, 1), :],
                              x_vmem.at[pl.ds(r, 1), :],
                              sem.at[0]).wait()

    # 2) im2col conv: one K = k_max*E (=128) matmul instead of k_max skinny ones.
    #    Cross-batch / pad-row leakage at tile tails hits only zero-weight taps
    #    or positions masked before the max-pool (same argument as v1).
    x = x_vmem[...]                                                  # (rows+k_max-1, E) f32
    x_taps = jnp.concatenate([x[j:j + rows, :] for j in range(k_max)],
                             axis=1)                                 # (rows, k_max*E)
    acc = jnp.dot(x_taps.astype(jnp.bfloat16), w_ref[...],
                  preferred_element_type=jnp.float32)                # (rows, CPAD) f32
    h = jnp.maximum(acc + b_ref[...], 0.0)                           # ReLU (f32 on VPU)

    # 3) Global max-pool over time with a precomputed {0,1} position mask
    #    (safe: ReLU output >= 0 and every real branch has >= 1 valid position;
    #    pad channels are fully masked -> 0 -> zero FC rows).
    h3 = h.reshape(TB, L, cpad) * mask_ref[...]
    pooled = jnp.max(h3, axis=1)                                     # (TB, CPAD)

    # 4) Fused FC (weights pre-permuted to packed channel order, zero-padded).
    o_ref[...] = (jnp.dot(pooled.astype(jnp.bfloat16), fcw_ref[...],
                          preferred_element_type=jnp.float32)
                  + fcb_ref[...]).astype(o_ref.dtype)


# ---------------------------------------------------------------------------
# One-time param packing (torch layouts -> fused-kernel layouts).
# ---------------------------------------------------------------------------
def pack_textcnn_params(embedding, conv_w, conv_b, fc_w, fc_b,
                        kernel_sizes, seq_len):
    """conv_w[i]: torch Conv1d weight (C, E, k_i); conv_b[i]: (C,);
    fc_w: torch Linear weight (N, nk*C); fc_b: (N,)."""
    nk = len(kernel_sizes)
    C, E, _ = conv_w[0].shape
    k_max = max(kernel_sizes)
    cpack = nk * C
    num_classes = fc_w.shape[0]
    assert cpack <= CPAD and num_classes <= NPAD

    w_pack = jnp.zeros((k_max, E, CPAD), jnp.float32)
    b_pack = jnp.zeros((1, CPAD), jnp.float32)
    mask = jnp.zeros((seq_len, CPAD), jnp.float32)
    for i, k in enumerate(kernel_sizes):
        w_i = jnp.transpose(conv_w[i], (2, 1, 0))             # (k, E, C)
        w_pack = w_pack.at[:k, :, i * C:(i + 1) * C].set(w_i)
        b_pack = b_pack.at[0, i * C:(i + 1) * C].set(conv_b[i])
        mask = mask.at[:seq_len - k + 1, i * C:(i + 1) * C].set(1.0)
    # im2col weight: row index = tap*E + e, matching concat([x[j:j+rows]], axis=1).
    w2d = w_pack.reshape(k_max * E, CPAD).astype(jnp.bfloat16)

    # torch flatten (cat(dim=2).view) order f = c*nk + i; packed order p = i*C + c.
    perm = jnp.array([c * nk + i for i in range(nk) for c in range(C)], jnp.int32)
    fcw = jnp.zeros((CPAD, NPAD), jnp.float32)
    fcw = fcw.at[:cpack, :num_classes].set(fc_w.T[perm])
    fcb = jnp.zeros((1, NPAD), jnp.float32).at[0, :num_classes].set(fc_b)

    return dict(embedding=embedding.astype(jnp.float32), w2d=w2d,
                b_pack=b_pack, mask=mask, fc_w=fcw.astype(jnp.bfloat16),
                fc_b=fcb, k_max=k_max, num_classes=num_classes)


def text_cnn_forward(token_ids, packed, *, batch_tile=None):
    B, L = token_ids.shape
    E = packed["embedding"].shape[1]
    k_max = packed["k_max"]
    tb = batch_tile if batch_tile is not None else (8 if B % 8 == 0 else B)
    assert B % tb == 0, "batch tile must divide batch"
    rows = tb * L

    ids_flat = token_ids.reshape(-1).astype(jnp.int32)
    kern = functools.partial(textcnn_kernel, TB=tb, L=L, E=E, k_max=k_max)

    grid_spec = pltpu.PrefetchScalarGridSpec(
        num_scalar_prefetch=1,                                # token ids -> SMEM
        grid=(B // tb,),
        in_specs=[
            pl.BlockSpec(memory_space=pl.ANY),                # embedding stays in HBM
            pl.BlockSpec((k_max * E, CPAD), lambda i, ids: (0, 0)),
            pl.BlockSpec((1, CPAD), lambda i, ids: (0, 0)),
            pl.BlockSpec((L, CPAD), lambda i, ids: (0, 0)),
            pl.BlockSpec((CPAD, NPAD), lambda i, ids: (0, 0)),
            pl.BlockSpec((1, NPAD), lambda i, ids: (0, 0)),
        ],
        out_specs=pl.BlockSpec((tb, NPAD), lambda i, ids: (i, 0)),
        scratch_shapes=[
            pltpu.VMEM((rows + k_max - 1, E), jnp.float32),   # gathered embeddings
            pltpu.SemaphoreType.DMA((1,)),
        ],
    )
    out = pl.pallas_call(
        kern,
        out_shape=jax.ShapeDtypeStruct((B, NPAD), jnp.float32),
        grid_spec=grid_spec,
        compiler_params=pltpu.CompilerParams(
            dimension_semantics=("parallel",),                # megacore on v7x
            vmem_limit_bytes=32 * 1024 * 1024),
    )(ids_flat, packed["embedding"], packed["w2d"], packed["b_pack"],
      packed["mask"], packed["fc_w"], packed["fc_b"])
    return out[:, :packed["num_classes"]]


# ---------------------------------------------------------------------------
# Pure-JAX reference (mirrors the PyTorch forward) for the correctness check.
# ---------------------------------------------------------------------------
def reference_forward(token_ids, embedding, conv_w, conv_b, fc_w, fc_b,
                      kernel_sizes):
    B, L = token_ids.shape
    emb = jnp.take(embedding, token_ids, axis=0)              # (B, L, E)
    pooled = []
    for w, b, k in zip(conv_w, conv_b, kernel_sizes):
        l_out = L - k + 1
        conv = b[None, None, :]
        for j in range(k):
            conv = conv + jnp.einsum(
                "ble,ce->blc", emb[:, j:j + l_out, :], w[:, :, j],
                precision=jax.lax.Precision.HIGHEST)
        pooled.append(jnp.max(jnp.maximum(conv, 0.0), axis=1))  # (B, C)
    feat = jnp.stack(pooled, axis=-1).reshape(B, -1)          # cat(dim=2).view
    return (jnp.dot(feat, fc_w.T, precision=jax.lax.Precision.HIGHEST)
            + fc_b[None, :])


if __name__ == "__main__":
    # Small, module-consistent shapes (k_max*E = 128 -> full MXU K depth).
    VOCAB, EMBED, NUM_CH, NUM_CLASSES = 50, 32, 8, 4
    KERNEL_SIZES = (2, 3, 4)
    B, L = 16, 16                                              # grid = (2,), TB = 8

    key = jax.random.PRNGKey(0)
    keys = jax.random.split(key, 9)

    # nn.Embedding(VOCAB, EMBED)
    embedding = jax.random.normal(keys[0], (VOCAB, EMBED), jnp.float32) * 0.1
    # torch Conv1d weights (C, E, k) and biases (C,)
    conv_w = [jax.random.normal(keys[1 + i], (NUM_CH, EMBED, k),
                                jnp.float32) * 0.1
              for i, k in enumerate(KERNEL_SIZES)]
    conv_b = [jax.random.normal(keys[4 + i], (NUM_CH,), jnp.float32) * 0.1
              for i in range(len(KERNEL_SIZES))]
    FEAT = len(KERNEL_SIZES) * NUM_CH
    # torch Linear weight (N, FEAT), bias (N,)
    fc_w = jax.random.normal(keys[7], (NUM_CLASSES, FEAT), jnp.float32) * 0.1
    fc_b = jax.random.normal(keys[8], (NUM_CLASSES,), jnp.float32) * 0.1

    token_ids = jax.random.randint(jax.random.PRNGKey(1), (B, L), 0, VOCAB)

    packed = pack_textcnn_params(embedding, conv_w, conv_b, fc_w, fc_b,
                                 KERNEL_SIZES, L)
    logits = text_cnn_forward(token_ids, packed, batch_tile=8)
    jax.block_until_ready(logits)
    assert logits.shape == (B, NUM_CLASSES), logits.shape

    ref = reference_forward(token_ids, embedding, conv_w, conv_b, fc_w, fc_b,
                            KERNEL_SIZES)
    max_err = float(jnp.max(jnp.abs(logits - ref)))
    # bf16 MXU operands with f32 accumulation: small, bounded precision loss.
    assert max_err < 2e-2, f"kernel/reference mismatch, max abs err={max_err}"

    print("KERNEL_OK")
</pallas_src>

<mosaic_0001>
module attributes {stable_mosaic.version = 11 : i64} {
  func.func @textcnn_kernel(%arg0: i32, %arg1: memref<256xi32, #tpu.memory_space<smem>>, %arg2: memref<50x32xf32, #tpu.memory_space<any>>, %arg3: memref<128x128xbf16, #tpu.memory_space<vmem>>, %arg4: memref<1x128xf32, #tpu.memory_space<vmem>>, %arg5: memref<16x128xf32, #tpu.memory_space<vmem>>, %arg6: memref<128x128xbf16, #tpu.memory_space<vmem>>, %arg7: memref<1x128xf32, #tpu.memory_space<vmem>>, %arg8: memref<8x128xf32, #tpu.memory_space<vmem>>, %arg9: memref<131x32xf32, #tpu.memory_space<vmem>>, %arg10: memref<1x!tpu.dma_semaphore, #tpu.memory_space<semaphore_mem>>) attributes {dimension_semantics = [#tpu.dimension_semantics<parallel>], iteration_bounds = array<i64: 2>, scalar_prefetch = 1 : i64, scratch_operands = 2 : i64, tpu.core_type = #tpu.core_type<tc>, window_params = [{}, {pipeline_mode = #tpu.pipeline_mode<synchronous>, transform_indices = @transform_1, window_bounds = array<i64: 128, 128>}, {pipeline_mode = #tpu.pipeline_mode<synchronous>, transform_indices = @transform_2, window_bounds = array<i64: 1, 128>}, {pipeline_mode = #tpu.pipeline_mode<synchronous>, transform_indices = @transform_3, window_bounds = array<i64: 16, 128>}, {pipeline_mode = #tpu.pipeline_mode<synchronous>, transform_indices = @transform_4, window_bounds = array<i64: 128, 128>}, {pipeline_mode = #tpu.pipeline_mode<synchronous>, transform_indices = @transform_5, window_bounds = array<i64: 1, 128>}, {transform_indices = @transform_6, window_bounds = array<i64: 8, 128>}]} {
    %c128_i32 = arith.constant 128 : i32
    %0 = arith.muli %arg0, %c128_i32 : i32
    %c0_i32 = arith.constant 0 : i32
    %c128_i32_0 = arith.constant 128 : i32
    %1 = arith.addi %c0_i32, %c128_i32_0 : i32
    %c1_i32 = arith.constant 1 : i32
    scf.for %arg11 = %c0_i32 to %1 step %c1_i32  : i32 {
      %c1_i32_24 = arith.constant 1 : i32
      %32 = arith.muli %arg11, %c1_i32_24 : i32
      %c0_i32_25 = arith.constant 0 : i32
      %33 = arith.addi %c0_i32_25, %32 : i32
      %34 = arith.addi %0, %33 : i32
      %35 = arith.index_cast %34 : i32 to index
      %36 = memref.load %arg1[%35] : memref<256xi32, #tpu.memory_space<smem>>
      %c0_i32_26 = arith.constant 0 : i32
      %c0_i32_27 = arith.constant 0 : i32
      %37 = tpu.memref_slice %arg2[%36, %c0_i32_27] : memref<50x32xf32, #tpu.memory_space<any>> -> memref<1x32xf32, #tpu.memory_space<any>>
      %c0_i32_28 = arith.constant 0 : i32
      %38 = tpu.memref_slice %arg9[%33, %c0_i32_28] : memref<131x32xf32, #tpu.memory_space<vmem>> -> memref<1x32xf32, #tpu.memory_space<vmem>>
      %39 = tpu.memref_slice %arg10[%c0_i32_26] : memref<1x!tpu.dma_semaphore, #tpu.memory_space<semaphore_mem>> -> memref<1x!tpu.dma_semaphore, #tpu.memory_space<semaphore_mem>>
      %40 = tpu.memref_squeeze %39 : memref<1x!tpu.dma_semaphore, #tpu.memory_space<semaphore_mem>> -> memref<!tpu.dma_semaphore, #tpu.memory_space<semaphore_mem>>
      tpu.enqueue_dma source(%37 : memref<1x32xf32, #tpu.memory_space<any>>) target(%38 : memref<1x32xf32, #tpu.memory_space<vmem>>) target_semaphore(%40 : memref<!tpu.dma_semaphore, #tpu.memory_space<semaphore_mem>>)
    }
    %c128_i32_1 = arith.constant 128 : i32
    %cst = arith.constant 0.000000e+00 : f32
    %2 = vector.broadcast %cst : f32 to vector<3x32xf32>
    %c128 = arith.constant 128 : index
    %c0 = arith.constant 0 : index
    %3 = vector.load %arg9[%c128, %c0] : memref<131x32xf32, #tpu.memory_space<vmem>>, vector<3x32xf32>
    tpu.vector_store %arg9[%c128, %c0], %2 {strides = array<i32>} : memref<131x32xf32, #tpu.memory_space<vmem>>, vector<3x32xf32>,
    %c0_i32_2 = arith.constant 0 : i32
    %c128_i32_3 = arith.constant 128 : i32
    %4 = arith.addi %c0_i32_2, %c128_i32_3 : i32
    %c1_i32_4 = arith.constant 1 : i32
    scf.for %arg11 = %c0_i32_2 to %4 step %c1_i32_4  : i32 {
      %c1_i32_24 = arith.constant 1 : i32
      %32 = arith.muli %arg11, %c1_i32_24 : i32
      %c0_i32_25 = arith.constant 0 : i32
      %33 = arith.addi %c0_i32_25, %32 : i32
      %c0_i32_26 = arith.constant 0 : i32
      %c0_i32_27 = arith.constant 0 : i32
      %c0_i32_28 = arith.constant 0 : i32
      %34 = tpu.memref_slice %arg2[%c0_i32_27, %c0_i32_28] : memref<50x32xf32, #tpu.memory_space<any>> -> memref<1x32xf32, #tpu.memory_space<any>>
      %c0_i32_29 = arith.constant 0 : i32
      %35 = tpu.memref_slice %arg9[%33, %c0_i32_29] : memref<131x32xf32, #tpu.memory_space<vmem>> -> memref<1x32xf32, #tpu.memory_space<vmem>>
      %36 = tpu.memref_slice %arg10[%c0_i32_26] : memref<1x!tpu.dma_semaphore, #tpu.memory_space<semaphore_mem>> -> memref<1x!tpu.dma_semaphore, #tpu.memory_space<semaphore_mem>>
      %37 = tpu.memref_squeeze %36 : memref<1x!tpu.dma_semaphore, #tpu.memory_space<semaphore_mem>> -> memref<!tpu.dma_semaphore, #tpu.memory_space<semaphore_mem>>
      tpu.wait_dma2 semaphore(%37 : memref<!tpu.dma_semaphore, #tpu.memory_space<semaphore_mem>>) src(%34 : memref<1x32xf32, #tpu.memory_space<any>>) dst(%35 : memref<1x32xf32, #tpu.memory_space<vmem>>)
    }
    %c128_i32_5 = arith.constant 128 : i32
    %c0_6 = arith.constant 0 : index
    %c0_7 = arith.constant 0 : index
    %5 = vector.load %arg9[%c0_6, %c0_7] : memref<131x32xf32, #tpu.memory_space<vmem>>, vector<131x32xf32>
    %6 = vector.extract_strided_slice %5 {offsets = [0, 0], sizes = [128, 32], strides = [1, 1]} : vector<131x32xf32> to vector<128x32xf32>
    %7 = vector.extract_strided_slice %5 {offsets = [1, 0], sizes = [128, 32], strides = [1, 1]} : vector<131x32xf32> to vector<128x32xf32>
    %8 = vector.extract_strided_slice %5 {offsets = [2, 0], sizes = [128, 32], strides = [1, 1]} : vector<131x32xf32> to vector<128x32xf32>
    %9 = vector.extract_strided_slice %5 {offsets = [3, 0], sizes = [128, 32], strides = [1, 1]} : vector<131x32xf32> to vector<128x32xf32>
    %10 = tpu.concatenate %6, %7, %8, %9 in 1 : vector<128x32xf32>, vector<128x32xf32>, vector<128x32xf32>, vector<128x32xf32> -> vector<128x128xf32>
    %11 = arith.truncf %10 : vector<128x128xf32> to vector<128x128xbf16>
    %c0_8 = arith.constant 0 : index
    %c0_9 = arith.constant 0 : index
    %12 = vector.load %arg3[%c0_8, %c0_9] : memref<128x128xbf16, #tpu.memory_space<vmem>>, vector<128x128xbf16>
    %cst_10 = arith.constant dense<0.000000e+00> : vector<128x128xf32>
    %13 = tpu.matmul %11, %12, %cst_10 {dimension_numbers = #tpu.dot_dimension_numbers<[1], [0], [0], [1], [0, 0, 1, 1], [], []>} : vector<128x128xbf16>, vector<128x128xbf16>, vector<128x128xf32> -> vector<128x128xf32>
    %c0_11 = arith.constant 0 : index
    %c0_12 = arith.constant 0 : index
    %14 = vector.load %arg4[%c0_11, %c0_12] : memref<1x128xf32, #tpu.memory_space<vmem>>, vector<1x128xf32>
    %15 = vector.broadcast %14 : vector<1x128xf32> to vector<128x128xf32>
    %16 = arith.addf %13, %15 : vector<128x128xf32>
    %cst_13 = arith.constant 0.000000e+00 : f32
    %17 = vector.broadcast %cst_13 : f32 to vector<128x128xf32>
    %18 = arith.maximumf %16, %17 : vector<128x128xf32>
    %19 = vector.shape_cast %18 : vector<128x128xf32> to vector<8x16x128xf32>
    %c0_14 = arith.constant 0 : index
    %c0_15 = arith.constant 0 : index
    %20 = vector.load %arg5[%c0_14, %c0_15] : memref<16x128xf32, #tpu.memory_space<vmem>>, vector<16x128xf32>
    %21 = vector.shape_cast %20 : vector<16x128xf32> to vector<1x16x128xf32>
    %22 = vector.broadcast %21 : vector<1x16x128xf32> to vector<8x16x128xf32>
    %23 = arith.mulf %19, %22 : vector<8x16x128xf32>
    %cst_16 = arith.constant dense<0xFF800000> : vector<8x128xf32>
    %24 = vector.multi_reduction <maximumf>, %23, %cst_16 [1] : vector<8x16x128xf32> to vector<8x128xf32>
    %25 = arith.truncf %24 : vector<8x128xf32> to vector<8x128xbf16>
    %c0_17 = arith.constant 0 : index
    %c0_18 = arith.constant 0 : index
    %26 = vector.load %arg6[%c0_17, %c0_18] : memref<128x128xbf16, #tpu.memory_space<vmem>>, vector<128x128xbf16>
    %cst_19 = arith.constant dense<0.000000e+00> : vector<8x128xf32>
    %27 = tpu.matmul %25, %26, %cst_19 {dimension_numbers = #tpu.dot_dimension_numbers<[1], [0], [0], [1], [0, 0, 1, 1], [], []>} : vector<8x128xbf16>, vector<128x128xbf16>, vector<8x128xf32> -> vector<8x128xf32>
    %c0_20 = arith.constant 0 : index
    %c0_21 = arith.constant 0 : index
    %28 = vector.load %arg7[%c0_20, %c0_21] : memref<1x128xf32, #tpu.memory_space<vmem>>, vector<1x128xf32>
    %29 = vector.broadcast %28 : vector<1x128xf32> to vector<8x128xf32>
    %30 = arith.addf %27, %29 : vector<8x128xf32>
    %c0_22 = arith.constant 0 : index
    %c0_23 = arith.constant 0 : index
    %31 = vector.load %arg8[%c0_22, %c0_23] : memref<8x128xf32, #tpu.memory_space<vmem>>, vector<8x128xf32>
    tpu.vector_store %arg8[%c0_22, %c0_23], %30 {strides = array<i32>} : memref<8x128xf32, #tpu.memory_space<vmem>>, vector<8x128xf32>,
    return
  }
  func.func @transform_1(%arg0: i32, %arg1: memref<256xi32, #tpu.memory_space<smem>>) -> (i32, i32) {
    %c0_i32 = arith.constant 0 : i32
    %c0_i32_0 = arith.constant 0 : i32
    %c0_i32_1 = arith.constant 0 : i32
    return %c0_i32, %c0_i32_0 : i32, i32
  }
  func.func @transform_2(%arg0: i32, %arg1: memref<256xi32, #tpu.memory_space<smem>>) -> (i32, i32) {
    %c0_i32 = arith.constant 0 : i32
    %c0_i32_0 = arith.constant 0 : i32
    %c0_i32_1 = arith.constant 0 : i32
    return %c0_i32, %c0_i32_0 : i32, i32
  }
  func.func @transform_3(%arg0: i32, %arg1: memref<256xi32, #tpu.memory_space<smem>>) -> (i32, i32) {
    %c0_i32 = arith.constant 0 : i32
    %c0_i32_0 = arith.constant 0 : i32
    %c0_i32_1 = arith.constant 0 : i32
    return %c0_i32, %c0_i32_0 : i32, i32
  }
  func.func @transform_4(%arg0: i32, %arg1: memref<256xi32, #tpu.memory_space<smem>>) -> (i32, i32) {
    %c0_i32 = arith.constant 0 : i32
    %c0_i32_0 = arith.constant 0 : i32
    %c0_i32_1 = arith.constant 0 : i32
    return %c0_i32, %c0_i32_0 : i32, i32
  }
  func.func @transform_5(%arg0: i32, %arg1: memref<256xi32, #tpu.memory_space<smem>>) -> (i32, i32) {
    %c0_i32 = arith.constant 0 : i32
    %c0_i32_0 = arith.constant 0 : i32
    %c0_i32_1 = arith.constant 0 : i32
    return %c0_i32, %c0_i32_0 : i32, i32
  }
  func.func @transform_6(%arg0: i32, %arg1: memref<256xi32, #tpu.memory_space<smem>>) -> (i32, i32) {
    %c0_i32 = arith.constant 0 : i32
    %c0_i32_0 = arith.constant 0 : i32
    return %arg0, %c0_i32 : i32, i32
  }
}

</mosaic_0001>

<bundles_post_ra>
// kernel: tpu_custom_call.1
= control target key start
LH: loop header
LB: loop body
LE: loop exit
PB: predicated region body
PF: predicated region fallthrough
CT: control target
= control target key end

     0   :  { %s2093_s0 = inlined_call_operand.vmem [shape: s32[256], index: 0, kind: input, shape index: {}]   ;;  %s2094_s1 = inlined_call_operand.vmem [shape: f32[50,32], index: 1, kind: input, shape index: {}]   ;;  %s2095_s2 = inlined_call_operand.vmem [shape: bf16[128,128], index: 2, kind: input, shape index: {}]   ;;  %s2096_s3 = inlined_call_operand.vmem [shape: f32[1,128], index: 3, kind: input, shape index: {}]   ;;  %s2097_s4 = inlined_call_operand.vmem [shape: f32[16,128], index: 4, kind: input, shape index: {}]   ;;  %s2098_s5 = inlined_call_operand.hbm [shape: bf16[128,128], index: 5, kind: input, shape index: {}]   ;;  %s2099_s6 = inlined_call_operand.vmem [shape: f32[1,128], index: 6, kind: input, shape index: {}]   ;;  %s2100_s7 = inlined_call_operand.hbm [shape: f32[16,128], index: 7, kind: output, shape index: {}]  }
   0x1   :  { %s12_s26 = sshll.u32 %s2093_s0, 4  ;;  %s13_s26 = int_to_ptr.vmem [resolvable:$true] %s12_s26 }
   0x2   :  { %s1462_s27 = scalar_lea.vmem %s13_s26, 32  ;;  %p1467_p1 = scmp.lt.s32.totalorder %s13_s26, %s13_s26 }
   0x3   :  { %p1463_p0 = scmp.ne.s32.totalorder %s13_s26, %s1462_s27  ;;  %p1468_p2 = scmp.lt.s32.totalorder %s1462_s27, %s1462_s27 }
   0x5   :  { %p1469_p3 = por %p1468_p2, %p1467_p1 }
   0x7   :  { %p1470_p4 = pnand %p1469_p3, %p1463_p0 }
   0x9   :  { %1473 = shalt.err (!%p1470_p4)  }
   0xa   :  { %s1586_s28 = smov [#allocation5]  }
   0xb   :  { %15 = dma.vmem_to_smem %s13_s26, 32, %s1586_s28, [#allocation4] }
   0xc   :  { %1550 = dma.done.wait [#allocation4], 32 }
   0xd   :  { %1551 = vsyncadd [#allocation4], 4294967264 }
   0xe   :  { %17 = sfence }
   0xf   :  { %18 = vsyncpa [#allocation7], 0 }
  0x10   :  { %19 = vsyncpa [#allocation8], 0 }
  0x11   :  { %21 = vsyncpa [#allocation8 + $0x1], 0  ;;  %s1639_s29 = smov 0   ;;  %s1641_s30 = smov 0  }
  0x12   :  { %s1643_s0 = smov 0   ;;  %s1645_s8 = smov 0  }
  0x13 LB: > { %s1660_s9 = sadd.s32 4294967295, %s1576_s8   ;;  %s1145_s10 = sadd.s32 4294967294, %s1576_s8   ;;  %s1576_s8 = sphi %s1645_s8, %s2108_s8   ;;  %s1572_s0 = sphi %s1643_s0, %s2107_s0   ;;  %s1568_s30 = sphi %s1641_s30, %s2106_s30   ;;  %s1564_s29 = sphi %s1639_s29, %s2105_s29  }
  0x14   : > { %s1664_s11 = sadd.s32 1, %s1576_s8   ;;  %s139_s12 = sadd.s32 1, %s1572_s0 }
  0x15   : > { %s136_s13 = ssub.s32 %s1576_s8, %s1664_s11  ;;  %p149_p5 = scmp.ne.s32.totalorder %s1572_s0, %s1568_s30 }
  0x16   : > { %p137_p6 = scmp.eq.s32.totalorder %s136_s13, 0  ;;  %p150_p7 = scmp.eq.s32.totalorder %s1660_s9, 1 }
  0x17   : > { %p155_p8 = scmp.ne.s32.totalorder %s1568_s30, %s1564_s29  ;;  %p156_p9 = scmp.eq.s32.totalorder %s1145_s10, 1 }
  0x18   : > { %s1675_s14 = scalar_select %p137_p6, %s1572_s0, %s139_s12  }
  0x19   : > { %p1677_p10 = por %p150_p7, %p149_p5  ;;  %p1681_p11 = por %p156_p9, %p155_p8 }
  0x1a   : > { %p1146_p12 = scmp.ge.s32.totalorder %s1576_s8, 1  ;;  %p163_p13 = scmp.lt.s32.totalorder %s1576_s8, 3 }
  0x1b   : > { %s2102_s16 = scalar_select %p1681_p11, 1, 0 }
  0x1c   : > { %p1266_p0 = scmp.eq.s32.totalorder %s1660_s9, 0  ;;  %p1688_p1 = pnand %p1146_p12, %p163_p13 }
  0x1d   : > { %s1587_s18 = smov [#allocation6]  }
  0x1e   : > { %s184_s19 = sshll.u32 %s1587_s18, 4  ;;  %p1258_p2 = pneg %p1688_p1  ;;  %s185_s19 = int_to_ptr.vmem [resolvable:$true] %s184_s19 }
  0x1f   : > { %s1485_s20 = scalar_lea.vmem %s185_s19, 1024  ;;  %p1493_p8 = scmp.lt.s32.totalorder %s185_s19, %s185_s19 }
  0x20   : > { %p1259_p3 = pnand %p1266_p0, %p1258_p2  ;;  %p1486_p5 = scmp.ne.s32.totalorder %s185_s19, %s1485_s20 }
  0x21   : > { %p1494_p9 = scmp.lt.s32.totalorder %s1485_s20, %s1485_s20 }
  0x22   : > { %p1476_p4 = pneg %p1259_p3 }
  0x23   : > { %p1495_p11 = por %p1494_p9, %p1493_p8 }
  0x24   : > { %p1488_p6 = pnand %p1486_p5, %p1476_p4 }
  0x26   : > { %p1489_p7 = pneg %p1488_p6 }
  0x28   : > { %p1496_p12 = pnand %p1495_p11, %p1489_p7 }
  0x2a   : > { %1499 = shalt.err (!%p1496_p12)
}
  0x2b   : > { %s1588_s21 = smov 64   ;;  %s1589_s22 = smov 4  }
  0x2c   : > { %1261 = dma.hbm_to_vmem [thread:$0]  (!%p1259_p3), %s2098_s5, 1024, %s185_s19, [#allocation7], %s1588_s21, %s1588_s21, %s1589_s22  }
  0x2d   : > { %203 = sbr.rel (%p1688_p1) target bundleno = 683 (0x2ab), region = 40 }
  0x32   : > { %1553 = dma.done.wait (%p1266_p0), [#allocation7], 1024  }
  0x33   : > { %1555 = vsyncadd (%p1266_p0), [#allocation7], 4294966272  ;;  %s223_s25 = sand.u32 1, %s1568_s30   ;;  %s1151_s26 = sshll.u32 %s1660_s9, 7 }
  0x34   : > { %s1709_s27 = sshll.u32 %s223_s25, 3  ;;  %s1578_s10 = smov 0  }
  0x35   : > { %s225_s28 = scalar_lea.vmem [#allocation9], %s1709_s27 }
  0x36 LB: >> { %s234_s12 = sadd.s32 %s1580_s10, %s1151_s26  ;;  %s237_s20 = scalar_lea.vmem [#allocation2], %s1580_s10  ;;  %s1580_s10 = sphi %s1578_s10, %s233_s10  }
  0x37   : >> { %s235_s13 = sld [smem:[#allocation5 + %s234_s12]] }
  0x3d   : >> { %s236_s19 = scalar_lea.vmem %s2094_s1, %s235_s13 }
  0x3e   : >> { %v256_v0 = vld [vmem:[%s236_s19] sm:$0x1] }
  0x3f   : >> { %257 = vst [vmem:[%s237_s20] sm:$0x1] %v256_v0 }
  0x40   : >> { %283 = vsyncadd [#allocation3], 16  ;;  %s233_s10 = sadd.s32 1, %s1580_s10  }
  0x41   : >> { %p230_p11 = scmp.ge.s32.totalorder %s233_s10, 128  }
  0x42   : > { %vm284_vm0 = vcmask (%p230_p11), 256000   ;;  %v1590_v1 = vmov (%p230_p11), 0.0   ;;  %s1582_s21 = smov (%p230_p11), 0  }
  0x43   : > { %232 = sbr.rel (!%p230_p11) target bundleno = 54 (0x36), region = 133  ;;  %285 = vst.msk [vmem:[#allocation2 + $0x80] sm:$0x7] (%p230_p11), %vm284_vm0, %v1590_v1 }
  0x48 LB: >> { %1556 = dma.done.wait [#allocation3], 16  ;;  %s1584_s21 = sphi %s1582_s21, %s291_s21  }
  0x49   : >> { %1557 = vsyncadd [#allocation3], 4294967280  ;;  %s291_s21 = sadd.s32 1, %s1584_s21  }
  0x4a   : >> { %p288_p13 = scmp.ge.s32.totalorder %s291_s21, 128  }
  0x4b   : > { %v1718_v2 = vld [vmem:[#allocation2] sm:$0xff] (%p288_p13)  ;;  %v1720_v3 = vld [vmem:[#allocation2 + $0x8] sm:$0xff] (%p288_p13)  ;;  %v1722_v4 = vld [vmem:[#allocation2 + $0x10] sm:$0xff] (%p288_p13)  ;;  %vm411_vm1 = vcmask (%p288_p13), 1045504   ;;  %vm329_vm2 = vcmask (%p288_p13), 1046528   ;;  %1232 = vmatprep.subr.bf16.mxu1 (%p288_p13), %v1590_v1  ;;  %s1591_s22 = smov (%p288_p13), 64  }
  0x4c   : > { %290 = sbr.rel (!%p288_p13) target bundleno = 72 (0x48), region = 144  ;;  %v412_v5 = vrot.slane (%p288_p13), %v1718_v2, 2  ;;  %v413_v6 = vrot.slane (%p288_p13), %v1720_v3, 2  ;;  %v415_v7 = vrot.slane (%p288_p13), %v1722_v4, 2  ;;  %v330_v8 = vrot.slane (%p288_p13), %v1718_v2, 1  ;;  %v1729_v9 = vld [vmem:[#allocation2 + $0x18] sm:$0xff] (%p288_p13) }
  0x4d   : > { %v331_v10 = vrot.slane (%p288_p13), %v1720_v3, 1  ;;  %v333_v11 = vrot.slane (%p288_p13), %v1722_v4, 1  ;;  %v1733_v12 = vld [vmem:[#allocation2 + $0x20] sm:$0xff] (%p288_p13)  ;;  %v417_v13 = vrot.slane (%p288_p13), %v1729_v9, 2  ;;  %v335_v14 = vrot.slane (%p288_p13), %v1729_v9, 1  ;;  %v1744_v23 = vld [vmem:[#allocation2 + $0x30] sm:$0xff] (%p288_p13) }
  0x4e   : > { %v414_v15 = vsel (%p288_p13), %vm411_vm1, %v412_v5, %v413_v6  ;;  %v416_v16 = vsel (%p288_p13), %vm411_vm1, %v413_v6, %v415_v7  ;;  %v419_v17 = vrot.slane (%p288_p13), %v1733_v12, 2  ;;  %v337_v18 = vrot.slane (%p288_p13), %v1733_v12, 1  ;;  %v1751_v28 = vld [vmem:[#allocation2 + $0x38] sm:$0xff] (%p288_p13)  ;;  %v1753_v29 = vld [vmem:[#allocation2 + $0x40] sm:$0xff] (%p288_p13)  ;;  %v1755_v30 = vld [vmem:[#allocation2 + $0x28] sm:$0xff] (%p288_p13)  ;;  %s1592_s23 = smov (%p288_p13), 32  }
  0x4f   : > { %v1336_v19 = vpack.i.bf16 (%p288_p13), %v416_v16, %v414_v15  ;;  %v332_v20 = vsel (%p288_p13), %vm329_vm2, %v330_v8, %v331_v10  ;;  %v334_v21 = vsel (%p288_p13), %vm329_vm2, %v331_v10, %v333_v11  ;;  %v418_v22 = vsel (%p288_p13), %vm411_vm1, %v415_v7, %v417_v13  ;;  %v1446_v46 = vld [vmem:[%s2095_s2 + $0x38] sm:$0xff] (%p288_p13)   ;;  %v1447_v49 = vld [vmem:[%s2095_s2 + $0x30] sm:$0xff] (%p288_p13)   ;;  %v1794_v60 = vld [vmem:[#allocation2 + $0x60] sm:$0xff] (%p288_p13)  ;;  %s1593_s19 = smov (%p288_p13), 96   ;;  %s1058_s18 = sshll.u32 (%p288_p13), %s225_s28, 4  ;;  %s2050_s18 = int_to_ptr.vmem [resolvable:$true] %s1058_s18 }
  0x50   : > { %v1326_v24 = vpack.i.bf16 (%p288_p13), %v334_v21, %v332_v20  ;;  %v420_v25 = vsel (%p288_p13), %vm411_vm1, %v417_v13, %v419_v17  ;;  %v336_v26 = vsel (%p288_p13), %vm329_vm2, %v333_v11, %v335_v14  ;;  %v338_v27 = vsel (%p288_p13), %vm329_vm2, %v335_v14, %v337_v18  ;;  %1200 = vmatprep.subr.bf16.mxu0 (%p288_p13), %v1446_v46  ;;  %v1790_v58 = vld [vmem:[#allocation2 + $0x50] sm:$0xff] (%p288_p13)  ;;  %v1792_v59 = vld [vmem:[#allocation2 + $0x58] sm:$0xff] (%p288_p13)  ;;  %v1448_v61 = vld [vmem:[%s2095_s2 + $0x28] sm:$0xff] (%p288_p13)   ;;  %s1595_s9 = smov (%p288_p13), [#allocation9]  }
  0x51   : > { %1337 = vrot.lane.b32.xlu1 %v1336_v19, %s1591_s22  ;;  %v1341_v31 = vpack.i.bf16 %v420_v25, %v418_v22  ;;  %v1331_v32 = vpack.i.bf16 %v338_v27, %v336_v26  ;;  %vm493_vm3 = vcmask 1044480   ;;  %v497_v33 = vrot.slane %v1722_v4, 3  ;;  %1201 = vmatpush3.bf16.msra.mxu0 %v1446_v46  ;;  %v1805_v6 = vld [vmem:[#allocation2 + $0x48] sm:$0xff]  ;;  %v1449_v16 = vld [vmem:[%s2095_s2 + $0x20] sm:$0xff]   ;;  %v1450_v25 = vld [vmem:[%s2095_s2 + $0x18] sm:$0xff]   ;;  %s1504_s24 = sshll.u32 %s1595_s9, 4  ;;  %s1505_s24 = int_to_ptr.vmem [resolvable:$false] %s1504_s24 }
  0x52   : > { %1327 = vrot.lane.b32.xlu0 %v1326_v24, %s1592_s23  ;;  %v499_v34 = vrot.slane %v1729_v9, 3  ;;  %v501_v35 = vrot.slane %v1733_v12, 3  ;;  %v494_v36 = vrot.slane %v1718_v2, 3  ;;  %v495_v37 = vrot.slane %v1720_v3, 3  ;;  %1202 = vmatprep.subr.bf16.mxu0 %v1447_v49  ;;  %p1507_p3 = scmp.lt.s32.totalorder %s2050_s18, %s1505_s24 }
  0x53   : > { %v341_v38 = vrot.slane %v1744_v23, 1  ;;  %v343_v39 = vrot.slane %v1751_v28, 1  ;;  %v345_v40 = vrot.slane %v1753_v29, 1  ;;  %v339_v41 = vrot.slane %v1755_v30, 1 }
  0x54   : > { %v500_v42 = vsel %vm493_vm3, %v497_v33, %v499_v34  ;;  %v502_v43 = vsel %vm493_vm3, %v499_v34, %v501_v35  ;;  %v496_v44 = vsel %vm493_vm3, %v494_v36, %v495_v37  ;;  %v498_v45 = vsel %vm493_vm3, %v495_v37, %v497_v33 }
  0x55   : > { %1342 = vrot.lane.b32.xlu1 %v1341_v31, %s1591_s22  ;;  %v1351_v47 = vpack.i.bf16 %v502_v43, %v500_v42  ;;  %v1346_v48 = vpack.i.bf16 %v498_v45, %v496_v44  ;;  %v344_v50 = vsel %vm329_vm2, %v341_v38, %v343_v39  ;;  %v346_v51 = vsel %vm329_vm2, %v343_v39, %v345_v40  ;;  %v1451_v44 = vld [vmem:[%s2095_s2 + $0x10] sm:$0xff]  }
  0x56   : > { %1332 = vrot.lane.b32.xlu0 %v1331_v32, %s1592_s23  ;;  %v340_v52 = vsel %vm329_vm2, %v337_v18, %v339_v41  ;;  %v423_v53 = vrot.slane %v1744_v23, 2  ;;  %v342_v54 = vsel %vm329_vm2, %v339_v41, %v341_v38  ;;  %v425_v55 = vrot.slane %v1751_v28, 2  ;;  %1203 = vmatpush3.bf16.msra.mxu0 %v1447_v49  ;;  %v1860_v49 = vld [vmem:[#allocation2 + $0x78] sm:$0xff] }
  0x57   : > { %v427_v56 = vrot.slane %v1753_v29, 2  ;;  %v421_v57 = vrot.slane %v1755_v30, 2  ;;  %v1361_v62 = vpack.i.bf16 %v346_v51, %v344_v50  ;;  %v505_v5 = vrot.slane %v1744_v23, 3  ;;  %1204 = vmatprep.subr.bf16.mxu0 %v1448_v61 }
  0x58   : > { %v426_v63 = vsel %vm411_vm1, %v423_v53, %v425_v55  ;;  %v1356_v7 = vpack.i.bf16 %v342_v54, %v340_v52  ;;  %v507_v8 = vrot.slane %v1751_v28, 3  ;;  %v509_v10 = vrot.slane %v1753_v29, 3  ;;  %v311_v52 = vld [vmem:[#allocation2 + $0x80] sm:$0x7] }
  0x59   : > { %1352 = vrot.lane.b32.xlu1 %v1351_v47, %s1593_s19  ;;  %v428_v0 = vsel %vm411_vm1, %v425_v55, %v427_v56  ;;  %v422_v11 = vsel %vm411_vm1, %v419_v17, %v421_v57  ;;  %v424_v13 = vsel %vm411_vm1, %v421_v57, %v423_v53  ;;  %v503_v14 = vrot.slane %v1755_v30, 3  ;;  %v1864_v53 = vld [vmem:[#allocation2 + $0x68] sm:$0xff] }
  0x5a   : > { %1347 = vrot.lane.b32.xlu0 %v1346_v48, %s1593_s19  ;;  %v1371_v15 = vpack.i.bf16 %v428_v0, %v426_v63  ;;  %v349_v18 = vrot.slane %v1790_v58, 1  ;;  %v351_v19 = vrot.slane %v1792_v59, 1  ;;  %v353_v20 = vrot.slane %v1794_v60, 1  ;;  %1205 = vmatpush3.bf16.msra.mxu0 %v1448_v61  ;;  %v1858_v48 = vld [vmem:[#allocation2 + $0x70] sm:$0xff]  ;;  %v1452_v63 = vld [vmem:[%s2095_s2 + $0x8] sm:$0xff]  }
  0x5b   : > { %v347_v17 = vrot.slane %v1805_v6, 1  ;;  %v1366_v21 = vpack.i.bf16 %v424_v13, %v422_v11  ;;  %v508_v22 = vsel %vm493_vm3, %v505_v5, %v507_v8  ;;  %v510_v24 = vsel %vm493_vm3, %v507_v8, %v509_v10  ;;  %1206 = vmatprep.subr.bf16.mxu0 %v1449_v16 }
  0x5c   : > { %v504_v26 = vsel %vm493_vm3, %v501_v35, %v503_v14  ;;  %v506_v27 = vsel %vm493_vm3, %v503_v14, %v505_v5  ;;  %v431_v31 = vrot.slane %v1790_v58, 2  ;;  %v433_v32 = vrot.slane %v1792_v59, 2 }
  0x5d   : > { %1362 = vrot.lane.b32.xlu1 %v1361_v62, %s1592_s23  ;;  %v1381_v33 = vpack.i.bf16 %v510_v24, %v508_v22  ;;  %v352_v34 = vsel %vm329_vm2, %v349_v18, %v351_v19  ;;  %v354_v36 = vsel %vm329_vm2, %v351_v19, %v353_v20  ;;  %v435_v37 = vrot.slane %v1794_v60, 2 }
  0x5e   : > { %1357 = vrot.lane.b32.xlu0 %v1356_v7, %s1592_s23  ;;  %v1376_v35 = vpack.i.bf16 %v506_v27, %v504_v26  ;;  %v429_v38 = vrot.slane %v1805_v6, 2  ;;  %v348_v39 = vsel %vm329_vm2, %v345_v40, %v347_v17  ;;  %v350_v41 = vsel %vm329_vm2, %v347_v17, %v349_v18  ;;  %1207 = vmatpush3.bf16.msra.mxu0 %v1449_v16 }
  0x5f   : > { %v1391_v42 = vpack.i.bf16 %v354_v36, %v352_v34  ;;  %v434_v43 = vsel %vm411_vm1, %v431_v31, %v433_v32  ;;  %1208 = vmatprep.subr.bf16.mxu0 %v1450_v25  ;;  %v436_v45 = vsel %vm411_vm1, %v433_v32, %v435_v37  ;;  %v513_v46 = vrot.slane %v1790_v58, 3 }
  0x60   : > { %v515_v40 = vrot.slane %v1792_v59, 3  ;;  %v517_v47 = vrot.slane %v1794_v60, 3  ;;  %v1386_v50 = vpack.i.bf16 %v350_v41, %v348_v39  ;;  %v511_v51 = vrot.slane %v1805_v6, 3 }
  0x61   : > { %1372 = vrot.lane.b32.xlu1 %v1371_v15, %s1591_s22  ;;  %v430_v54 = vsel %vm411_vm1, %v427_v56, %v429_v38  ;;  %v432_v55 = vsel %vm411_vm1, %v429_v38, %v431_v31  ;;  %v1401_v57 = vpack.i.bf16 %v436_v45, %v434_v43  ;;  %v357_v61 = vrot.slane %v1858_v48, 1  ;;  %v1453_v15 = vld [vmem:[%s2095_s2] sm:$0xff]  }
  0x62   : > { %1367 = vrot.lane.b32.xlu0 %v1366_v21, %s1591_s22  ;;  %1209 = vmatpush3.bf16.msra.mxu0 %v1450_v25  ;;  %v359_v62 = vrot.slane %v1860_v49, 1  ;;  %v516_v0 = vsel %vm493_vm3, %v513_v46, %v515_v40  ;;  %v518_v5 = vsel %vm493_vm3, %v515_v40, %v517_v47  ;;  %v361_v56 = vrot.slane %v311_v52, 1 }
  0x63   : > { %1210 = vmatprep.subr.bf16.mxu0 %v1451_v44  ;;  %v355_v7 = vrot.slane %v1864_v53, 1  ;;  %v1396_v8 = vpack.i.bf16 %v432_v55, %v430_v54  ;;  %v512_v11 = vsel %vm493_vm3, %v509_v10, %v511_v51  ;;  %v514_v13 = vsel %vm493_vm3, %v511_v51, %v513_v46 }
  0x64   : > { %v1411_v14 = vpack.i.bf16 %v518_v5, %v516_v0  ;;  %v1406_v16 = vpack.i.bf16 %v514_v13, %v512_v11  ;;  %v360_v18 = vsel %vm329_vm2, %v357_v61, %v359_v62  ;;  %v362_v19 = vsel %vm329_vm2, %v359_v62, %v361_v56 }
  0x65   : > { %1382 = vrot.lane.b32.xlu1 %v1381_v33, %s1593_s19  ;;  %v356_v10 = vsel %vm329_vm2, %v353_v20, %v355_v7  ;;  %v358_v17 = vsel %vm329_vm2, %v355_v7, %v357_v61  ;;  %v439_v21 = vrot.slane %v1858_v48, 2  ;;  %v441_v22 = vrot.slane %v1860_v49, 2 }
  0x66   : > { %1377 = vrot.lane.b32.xlu0 %v1376_v35, %s1593_s19  ;;  %1211 = vmatpush3.bf16.msra.mxu0 %v1451_v44  ;;  %v443_v24 = vrot.slane %v311_v52, 2  ;;  %v437_v25 = vrot.slane %v1864_v53, 2  ;;  %v1421_v26 = vpack.i.bf16 %v362_v19, %v360_v18  ;;  %v1416_v27 = vpack.i.bf16 %v358_v17, %v356_v10 }
  0x67   : > { %1212 = vmatprep.subr.bf16.mxu0 %v1452_v63  ;;  %v521_v31 = vrot.slane %v1858_v48, 3  ;;  %v442_v20 = vsel %vm411_vm1, %v439_v21, %v441_v22  ;;  %v523_v33 = vrot.slane %v1860_v49, 3  ;;  %v525_v34 = vrot.slane %v311_v52, 3 }
  0x68   : > { %v444_v32 = vsel %vm411_vm1, %v441_v22, %v443_v24  ;;  %v438_v36 = vsel %vm411_vm1, %v435_v37, %v437_v25  ;;  %v440_v35 = vsel %vm411_vm1, %v437_v25, %v439_v21  ;;  %v519_v38 = vrot.slane %v1864_v53, 3 }
  0x69   : > { %1392 = vrot.lane.b32.xlu1 %v1391_v42, %s1592_s23  ;;  %v1431_v39 = vpack.i.bf16 %v444_v32, %v442_v20  ;;  %v1426_v41 = vpack.i.bf16 %v440_v35, %v438_v36  ;;  %v524_v42 = vsel %vm493_vm3, %v521_v31, %v523_v33  ;;  %v526_v43 = vsel %vm493_vm3, %v523_v33, %v525_v34 }
  0x6a   : > { %1387 = vrot.lane.b32.xlu0 %v1386_v50, %s1592_s23  ;;  %1213 = vmatpush3.bf16.msra.mxu0 %v1452_v63  ;;  %v520_v44 = vsel %vm493_vm3, %v517_v47, %v519_v38  ;;  %v522_v45 = vsel %vm493_vm3, %v519_v38, %v521_v31  ;;  %v1441_v37 = vpack.i.bf16 %v526_v43, %v524_v42  ;;  %vm575_vm4 = vcmask 261120  }
  0x6b   : > { %1214 = vmatprep.subr.bf16.mxu0 %v1453_v15  ;;  %v1436_v46 = vpack.i.bf16 %v522_v45, %v520_v44  ;;  %vm592_vm5 = vcmask 523264   ;;  %vm609_vm6 = vcmask 785408   ;;  %vm1594_vm7 = vmmov 0  }
  0x6c   : > { %1248 = vmatprep.mubr.msk.bf16.mxu1 %vm1594_vm7, %v1590_v1  ;;  %vm939_vm8 = vcmask 1041409   ;;  %vm941_vm9 = vcmask 1042434   ;;  %vm943_vm10 = vcmask 1043459   ;;  %vm945_vm11 = vcmask 1044484  }
  0x6d   : > { %1402 = vrot.lane.b32.xlu1 %v1401_v57, %s1591_s22  ;;  %vm947_vm12 = vcmask 1045509   ;;  %vm949_vm13 = vcmask 1046534   ;;  %vm951_vm14 = vcmask 1047559  }
  0x6e   : > { %1397 = vrot.lane.b32.xlu0 %v1396_v8, %s1591_s22  ;;  %1215 = vmatpush3.bf16.msra.mxu0 %v1453_v15 }
  0x71   : > { %1412 = vrot.lane.b32.xlu1 %v1411_v14, %s1593_s19 }
  0x72   : > { %1407 = vrot.lane.b32.xlu0 %v1406_v16, %s1593_s19 }
  0x75   : > { %1422 = vrot.lane.b32.xlu1 %v1421_v26, %s1592_s23 }
  0x76   : > { %1417 = vrot.lane.b32.xlu0 %v1416_v27, %s1592_s23  ;;  %s1045_s23 = scalar_lea.sflag [#allocation8], %s223_s25 }
  0x79   : > { %1432 = vrot.lane.b32.xlu1 %v1431_v39, %s1591_s22 }
  0x7a   : > { %1427 = vrot.lane.b32.xlu0 %v1426_v41, %s1591_s22  ;;  %s2048_s22 = scalar_lea.hbm %s2100_s7, %s1151_s26  ;;  %s1506_s26 = scalar_lea.vmem %s1505_s24, 256 }
  0x7d   : > { %1442 = vrot.lane.b32.xlu1 %v1441_v37, %s1593_s19 }
  0x7e   : > { %1437 = vrot.lane.b32.xlu0 %v1436_v46, %s1593_s19  ;;  %s1500_s19 = scalar_lea.vmem %s2050_s18, 128 }
  0x7f   : > { %p1501_p0 = scmp.ne.s32.totalorder %s2050_s18, %s1500_s19  ;;  %p1508_p4 = scmp.lt.s32.totalorder %s1506_s26, %s1500_s19 }
  0x81   : > { %p1502_p1 = pnand %p1501_p0, %p1677_p10  ;;  %p1509_p5 = por %p1508_p4, %p1507_p3 }
  0x83   : > { %p1503_p2 = pneg %p1502_p1 }
  0x85   : > { %p1510_p6 = pnand %p1509_p5, %p1503_p2 }
  0xc3   : > { %v1338_v40 = vpop.permute.xlu1 %1337 }
  0xc4   : > { %v1328_v50 = vpop.permute.xlu0 %1327  ;;  %v1340_v63 = vunpack.i.h.bf16 %v1338_v40  ;;  %v1339_v0 = vunpack.i.l.bf16 %v1338_v40 }
  0xc5   : > { %v1330_v51 = vunpack.i.h.bf16 %v1328_v50  ;;  %v1329_v52 = vunpack.i.l.bf16 %v1328_v50 }
  0xc7   : > { %v1343_v54 = vpop.permute.xlu1 %1342  ;;  %v576_v8 = vsel %vm575_vm4, %v1718_v2, %v1329_v52  ;;  %v577_v11 = vsel %vm575_vm4, %v1720_v3, %v1330_v51 }
  0xc8   : > { %v1333_v55 = vpop.permute.xlu0 %1332  ;;  %v1345_v47 = vunpack.i.h.bf16 %v1343_v54  ;;  %v1344_v57 = vunpack.i.l.bf16 %v1343_v54 }
  0xc9   : > { %v1335_v61 = vunpack.i.h.bf16 %v1333_v55  ;;  %v1334_v62 = vunpack.i.l.bf16 %v1333_v55 }
  0xcb   : > { %v579_v5 = vsel %vm575_vm4, %v1729_v9, %v1335_v61  ;;  %v578_v56 = vsel %vm575_vm4, %v1722_v4, %v1334_v62  ;;  %v1353_v7 = vpop.permute.xlu1 %1352  ;;  %v593_v9 = vsel %vm592_vm5, %v576_v8, %v1339_v0  ;;  %v594_v4 = vsel %vm592_vm5, %v577_v11, %v1340_v63 }
  0xcc   : > { %v1355_v13 = vunpack.i.h.bf16 %v1353_v7  ;;  %v1354_v14 = vunpack.i.l.bf16 %v1353_v7  ;;  %v1348_v15 = vpop.permute.xlu0 %1347  ;;  %v595_v19 = vsel %vm592_vm5, %v578_v56, %v1344_v57  ;;  %v596_v10 = vsel %vm592_vm5, %v579_v5, %v1345_v47 }
  0xcd   : > { %v1350_v16 = vunpack.i.h.bf16 %v1348_v15  ;;  %v1349_v18 = vunpack.i.l.bf16 %v1348_v15 }
  0xce   : > { %v612_v17 = vsel %vm609_vm6, %v595_v19, %v1354_v14  ;;  %v613_v2 = vsel %vm609_vm6, %v596_v10, %v1355_v13 }
  0xcf   : > { %v1363_v21 = vpop.permute.xlu1 %1362  ;;  %v610_v3 = vsel %vm609_vm6, %v593_v9, %v1349_v18  ;;  %v611_v22 = vsel %vm609_vm6, %v594_v4, %v1350_v16  ;;  %v627_v24 = vpack.c.bf16 %v613_v2, %v612_v17 }
  0xd0   : > { %v1358_v25 = vpop.permute.xlu0 %1357  ;;  %v626_v26 = vpack.c.bf16 %v611_v22, %v610_v3  ;;  %v1365_v27 = vunpack.i.h.bf16 %v1363_v21  ;;  %v1364_v31 = vunpack.i.l.bf16 %v1363_v21 }
  0xd1   : > { %v1360_v32 = vunpack.i.h.bf16 %v1358_v25  ;;  %v1359_v33 = vunpack.i.l.bf16 %v1358_v25 }
  0xd2   : > { %1216 = vmatprep.mubr.bf16.mxu0 %v626_v26  ;;  %v583_v41 = vsel %vm575_vm4, %v1751_v28, %v1365_v27  ;;  %v582_v42 = vsel %vm575_vm4, %v1744_v23, %v1364_v31 }
  0xd3   : > { %1217 = vmatmul.mubr.bf16.vlgmr.msra.gmra.mxu0 %v627_v24  ;;  %v1373_v20 = vpop.permute.xlu1 %1372  ;;  %v581_v44 = vsel %vm575_vm4, %v1755_v30, %v1360_v32  ;;  %v580_v45 = vsel %vm575_vm4, %v1733_v12, %v1359_v33 }
  0xd4   : > { %v1368_v34 = vpop.permute.xlu0 %1367  ;;  %v1375_v36 = vunpack.i.h.bf16 %v1373_v20  ;;  %v1374_v35 = vunpack.i.l.bf16 %v1373_v20 }
  0xd5   : > { %v1370_v38 = vunpack.i.h.bf16 %v1368_v34  ;;  %v1369_v39 = vunpack.i.l.bf16 %v1368_v34 }
  0xd6   : > { %v599_v50 = vsel %vm592_vm5, %v582_v42, %v1374_v35  ;;  %v600_v51 = vsel %vm592_vm5, %v583_v41, %v1375_v36 }
  0xd7   : > { %v1383_v43 = vpop.permute.xlu1 %1382  ;;  %v597_v28 = vsel %vm592_vm5, %v580_v45, %v1369_v39  ;;  %v598_v23 = vsel %vm592_vm5, %v581_v44, %v1370_v38 }
  0xd8   : > { %v1385_v37 = vunpack.i.h.bf16 %v1383_v43  ;;  %v1384_v46 = vunpack.i.l.bf16 %v1383_v43  ;;  %v1378_v40 = vpop.permute.xlu0 %1377 }
  0xd9   : > { %v1380_v52 = vunpack.i.h.bf16 %v1378_v40  ;;  %v1379_v54 = vunpack.i.l.bf16 %v1378_v40 }
  0xda   : > { %v616_v55 = vsel %vm609_vm6, %v599_v50, %v1384_v46  ;;  %v617_v30 = vsel %vm609_vm6, %v600_v51, %v1385_v37 }
  0xdb   : > { %v1393_v47 = vpop.permute.xlu1 %1392  ;;  %v614_v12 = vsel %vm609_vm6, %v597_v28, %v1379_v54  ;;  %v615_v57 = vsel %vm609_vm6, %v598_v23, %v1380_v52  ;;  %v629_v61 = vpack.c.bf16 %v617_v30, %v616_v55 }
  0xdc   : > { %v1388_v62 = vpop.permute.xlu0 %1387  ;;  %v628_v63 = vpack.c.bf16 %v615_v57, %v614_v12  ;;  %v1395_v0 = vunpack.i.h.bf16 %v1393_v47  ;;  %v1394_v5 = vunpack.i.l.bf16 %v1393_v47 }
  0xdd   : > { %v1390_v7 = vunpack.i.h.bf16 %v1388_v62  ;;  %v1389_v8 = vunpack.i.l.bf16 %v1388_v62 }
  0xde   : > { %1220 = vmatprep.mubr.bf16.mxu0 %v628_v63  ;;  %v587_v18 = vsel %vm575_vm4, %v1792_v59, %v1395_v0  ;;  %v586_v19 = vsel %vm575_vm4, %v1790_v58, %v1394_v5  ;;  %v1454_v63 = vld [vmem:[#allocation6 + $0x38] sm:$0xff]   ;;  %v1455_v0 = vld [vmem:[#allocation6 + $0x30] sm:$0xff]   ;;  %v1456_v5 = vld [vmem:[#allocation6 + $0x28] sm:$0xff]  }
  0xdf   : > { %1221 = vmatmul.mubr.bf16.gmra.mxu0 %v629_v61  ;;  %v1403_v56 = vpop.permute.xlu1 %1402  ;;  %v585_v9 = vsel %vm575_vm4, %v1805_v6, %v1390_v7  ;;  %v584_v4 = vsel %vm575_vm4, %v1753_v29, %v1389_v8  ;;  %1233 = vmatpush3.bf16.msra.mxu1 %v1454_v63  ;;  %v1458_v7 = vld [vmem:[#allocation6 + $0x18] sm:$0xff]   ;;  %v1459_v8 = vld [vmem:[#allocation6 + $0x10] sm:$0xff]  }
  0xe0   : > { %v1398_v11 = vpop.permute.xlu0 %1397  ;;  %v1405_v13 = vunpack.i.h.bf16 %v1403_v56  ;;  %v1404_v14 = vunpack.i.l.bf16 %v1403_v56  ;;  %1234 = vmatprep.subr.bf16.mxu1 %v1590_v1  ;;  %v1457_v56 = vld [vmem:[#allocation6 + $0x20] sm:$0xff]  }
  0xe1   : > { %v1400_v15 = vunpack.i.h.bf16 %v1398_v11  ;;  %v1399_v16 = vunpack.i.l.bf16 %v1398_v11  ;;  %v1460_v11 = vld [vmem:[#allocation6 + $0x8] sm:$0xff]  }
  0xe2   : > { %v603_v3 = vsel %vm592_vm5, %v586_v19, %v1404_v14  ;;  %v604_v22 = vsel %vm592_vm5, %v587_v18, %v1405_v13  ;;  %v1461_v13 = vld [vmem:[#allocation6] sm:$0xff]   ;;  %v1994_v19 = vld [vmem:[%s2096_s3] ss:$0 sm:$0xff] }
  0xe3   : > { %v1413_v10 = vpop.permute.xlu1 %1412  ;;  %v601_v59 = vsel %vm592_vm5, %v584_v4, %v1399_v16  ;;  %v602_v58 = vsel %vm592_vm5, %v585_v9, %v1400_v15  ;;  %1235 = vmatpush3.bf16.msra.mxu1 %v1455_v0 }
  0xe4   : > { %v1415_v17 = vunpack.i.h.bf16 %v1413_v10  ;;  %v1414_v2 = vunpack.i.l.bf16 %v1413_v10  ;;  %v1408_v21 = vpop.permute.xlu0 %1407  ;;  %1236 = vmatprep.subr.bf16.mxu1 %v1590_v1 }
  0xe5   : > { %v1410_v24 = vunpack.i.h.bf16 %v1408_v21  ;;  %v1409_v25 = vunpack.i.l.bf16 %v1408_v21 }
  0xe6   : > { %v620_v26 = vsel %vm609_vm6, %v603_v3, %v1414_v2  ;;  %v621_v6 = vsel %vm609_vm6, %v604_v22, %v1415_v17 }
  0xe7   : > { %v1423_v27 = vpop.permute.xlu1 %1422  ;;  %v618_v29 = vsel %vm609_vm6, %v601_v59, %v1409_v25  ;;  %v619_v31 = vsel %vm609_vm6, %v602_v58, %v1410_v24  ;;  %v631_v20 = vpack.c.bf16 %v621_v6, %v620_v26  ;;  %1237 = vmatpush3.bf16.msra.mxu1 %v1456_v5  ;;  %v2004_v59 = vld [vmem:[%s2097_s4 + $0x8] sm:$0xff] }
  0xe8   : > { %v1418_v32 = vpop.permute.xlu0 %1417  ;;  %v630_v33 = vpack.c.bf16 %v619_v31, %v618_v29  ;;  %v1425_v34 = vunpack.i.h.bf16 %v1423_v27  ;;  %v1424_v36 = vunpack.i.l.bf16 %v1423_v27  ;;  %1238 = vmatprep.subr.bf16.mxu1 %v1590_v1  ;;  %v2012_v31 = vld [vmem:[%s2097_s4] sm:$0xff] }
  0xe9   : > { %v1420_v38 = vunpack.i.h.bf16 %v1418_v32  ;;  %v1419_v39 = vunpack.i.l.bf16 %v1418_v32 }
  0xea   : > { %1224 = vmatprep.mubr.bf16.mxu0 %v630_v33  ;;  %v591_v37 = vsel %vm575_vm4, %v1860_v49, %v1425_v34  ;;  %v590_v46 = vsel %vm575_vm4, %v1858_v48, %v1424_v36 }
  0xeb   : > { %1225 = vmatmul.mubr.bf16.gmra.mxu0 %v631_v20  ;;  %v1433_v35 = vpop.permute.xlu1 %1432  ;;  %v589_v50 = vsel %vm575_vm4, %v1864_v53, %v1420_v38  ;;  %v588_v51 = vsel %vm575_vm4, %v1794_v60, %v1419_v39  ;;  %1239 = vmatpush3.bf16.msra.mxu1 %v1457_v56 }
  0xec   : > { %v1428_v41 = vpop.permute.xlu0 %1427  ;;  %v1435_v42 = vunpack.i.h.bf16 %v1433_v35  ;;  %v1434_v43 = vunpack.i.l.bf16 %v1433_v35  ;;  %1240 = vmatprep.subr.bf16.mxu1 %v1590_v1 }
  0xed   : > { %v1430_v44 = vunpack.i.h.bf16 %v1428_v41  ;;  %v1429_v45 = vunpack.i.l.bf16 %v1428_v41 }
  0xee   : > { %v607_v23 = vsel %vm592_vm5, %v590_v46, %v1434_v43  ;;  %v608_v55 = vsel %vm592_vm5, %v591_v37, %v1435_v42 }
  0xef   : > { %v1443_v40 = vpop.permute.xlu1 %1442  ;;  %v605_v49 = vsel %vm592_vm5, %v588_v51, %v1429_v45  ;;  %v606_v48 = vsel %vm592_vm5, %v589_v50, %v1430_v44  ;;  %1241 = vmatpush3.bf16.msra.mxu1 %v1458_v7 }
  0xf0   : > { %v1445_v52 = vunpack.i.h.bf16 %v1443_v40  ;;  %v1444_v54 = vunpack.i.l.bf16 %v1443_v40  ;;  %v1438_v28 = vpop.permute.xlu0 %1437  ;;  %1242 = vmatprep.subr.bf16.mxu1 %v1590_v1 }
  0xf1   : > { %v1440_v30 = vunpack.i.h.bf16 %v1438_v28  ;;  %v1439_v47 = vunpack.i.l.bf16 %v1438_v28 }
  0xf2   : > { %v624_v12 = vsel %vm609_vm6, %v607_v23, %v1444_v54  ;;  %v625_v53 = vsel %vm609_vm6, %v608_v55, %v1445_v52 }
  0xf3   : > { %v622_v57 = vsel %vm609_vm6, %v605_v49, %v1439_v47  ;;  %v623_v60 = vsel %vm609_vm6, %v606_v48, %v1440_v30  ;;  %v633_v61 = vpack.c.bf16 %v625_v53, %v624_v12  ;;  %1243 = vmatpush3.bf16.msra.mxu1 %v1459_v8 }
  0xf4   : > { %v632_v62 = vpack.c.bf16 %v623_v60, %v622_v57  ;;  %1244 = vmatprep.subr.bf16.mxu1 %v1590_v1 }
  0xf6   : > { %1228 = vmatprep.mubr.bf16.mxu0 %v632_v62 }
  0xf7   : > { %1229 = vmatmul.mubr.bf16.gmra.mxu0 %v633_v61  ;;  %1245 = vmatpush3.bf16.msra.mxu1 %v1460_v11 }
  0xf8   : > { %1246 = vmatprep.subr.bf16.mxu1 %v1590_v1 }
  0xfb   : > { %1247 = vmatpush3.bf16.msra.mxu1 %v1461_v13 }
 0x193   : > { %v1218_v14 = vpop.f32.mrf.mxu0 }
 0x194   : > { %v748_v2 = vadd.f32 %v1218_v14, %v1994_v19 }
 0x195   : > { %v739_v15 = vpop.f32.mrf.mxu0 }
 0x196   : > { %v740_v9 = vadd.f32 %v1994_v19, %v739_v15  ;;  %v804_v58 = vmax.f32 %v748_v2, 0.0 }
 0x197   : > { %v1219_v16 = vpop.f32.mrf.mxu0 }
 0x198   : > { %v751_v4 = vadd.f32 %v1219_v16, %v1994_v19  ;;  %v802_v22 = vmax.f32 %v740_v9, 0.0  ;;  %v822_v38 = vmul.f32 %v2012_v31, %v804_v58 }
 0x199   : > { %v742_v18 = vpop.f32.mrf.mxu0 }
 0x19a   : > { %v743_v10 = vadd.f32 %v1994_v19, %v742_v18  ;;  %v805_v24 = vmax.f32 %v751_v4, 0.0  ;;  %v820_v33 = vmul.f32 %v2012_v31, %v802_v22 }
 0x19c   : > { %v803_v1 = vmax.f32 %v743_v10, 0.0  ;;  %v823_v34 = vmul.f32 %v2004_v59, %v805_v24 }
 0x19e   : > { %v821_v26 = vmul.f32 %v2004_v59, %v803_v1  ;;  %v843_v44 = vmax.f32 %v822_v38, %v823_v34 }
 0x19f   : > { %v1222_v17 = vpop.f32.mrf.mxu0 }
 0x1a0   : > { %v764_v6 = vadd.f32 %v1222_v17, %v1994_v19  ;;  %v836_v39 = vmax.f32 %v820_v33, %v821_v26  ;;  %v844_v28 = vrot.slane %v843_v44, 4 }
 0x1a1   : > { %v755_v21 = vpop.f32.mrf.mxu0 }
 0x1a2   : > { %v756_v3 = vadd.f32 %v1994_v19, %v755_v21  ;;  %v808_v41 = vmax.f32 %v764_v6, 0.0  ;;  %v837_v50 = vrot.slane %v836_v39, 4  ;;  %v845_v62 = vmax.f32 %v843_v44, %v844_v28 }
 0x1a3   : > { %v1223_v25 = vpop.f32.mrf.mxu0 }
 0x1a4   : > { %v767_v27 = vadd.f32 %v1223_v25, %v1994_v19  ;;  %v806_v20 = vmax.f32 %v756_v3, 0.0  ;;  %v826_v51 = vmul.f32 %v2012_v31, %v808_v41  ;;  %v838_v48 = vmax.f32 %v836_v39, %v837_v50 }
 0x1a5   : > { %v758_v29 = vpop.f32.mrf.mxu0  ;;  %v846_v15 = vrot.slane %v845_v62, 2 }
 0x1a6   : > { %v759_v32 = vadd.f32 %v1994_v19, %v758_v29  ;;  %v809_v36 = vmax.f32 %v767_v27, 0.0  ;;  %v824_v42 = vmul.f32 %v2012_v31, %v806_v20  ;;  %v839_v7 = vrot.slane %v838_v48, 2 }
 0x1a7   : > { %v847_v3 = vmax.f32 %v845_v62, %v846_v15 }
 0x1a8   : > { %v807_v35 = vmax.f32 %v759_v32, 0.0  ;;  %v827_v45 = vmul.f32 %v2004_v59, %v809_v36  ;;  %v840_v4 = vmax.f32 %v838_v48, %v839_v7 }
 0x1aa   : > { %v825_v43 = vmul.f32 %v2004_v59, %v807_v35  ;;  %v857_v23 = vmax.f32 %v826_v51, %v827_v45  ;;  %v841_v6 = vrot.slane %v840_v4, 1  ;;  %v848_v35 = vrot.slane %v847_v3, 1 }
 0x1ab   : > { %v1226_v37 = vpop.f32.mrf.mxu0 }
 0x1ac   : > { %v850_v46 = vmax.f32 %v824_v42, %v825_v43  ;;  %v780_v40 = vadd.f32 %v1226_v37, %v1994_v19  ;;  %v858_v63 = vrot.slane %v857_v23, 4  ;;  %v842_v44 = vmax.f32 %v840_v4, %v841_v6 }
 0x1ad   : > { %v771_v52 = vpop.f32.mrf.mxu0 }
 0x1ae   : > { %v851_v54 = vrot.slane %v850_v46, 4  ;;  %v772_v55 = vadd.f32 %v1994_v19, %v771_v52  ;;  %v812_v47 = vmax.f32 %v780_v40, 0.0  ;;  %v859_v16 = vmax.f32 %v857_v23, %v858_v63 }
 0x1af   : > { %v1227_v30 = vpop.f32.mrf.mxu0  ;;  %v849_v52 = vmax.f32 %v847_v3, %v848_v35 }
 0x1b0   : > { %v783_v49 = vadd.f32 %v1227_v30, %v1994_v19  ;;  %v852_v53 = vmax.f32 %v850_v46, %v851_v54  ;;  %v810_v57 = vmax.f32 %v772_v55, 0.0  ;;  %v830_v0 = vmul.f32 %v2012_v31, %v812_v47 }
 0x1b1   : > { %v774_v12 = vpop.f32.mrf.mxu0  ;;  %v860_v22 = vrot.slane %v859_v16, 2  ;;  %v892_v55 = vpack.c.bf16 %v842_v44, %v842_v44 }
 0x1b2   : > { %v813_v60 = vmax.f32 %v783_v49, 0.0  ;;  %v775_v61 = vadd.f32 %v1994_v19, %v774_v12  ;;  %v853_v8 = vrot.slane %v852_v53, 2  ;;  %v828_v11 = vmul.f32 %v2012_v31, %v810_v57 }
 0x1b3   : > { %v861_v38 = vmax.f32 %v859_v16, %v860_v22  ;;  %v893_v12 = vpack.c.bf16 %v849_v52, %v849_v52  ;;  %v931_v62 = vunpack.c.l.b16 %v892_v55 }
 0x1b4   : > { %v831_v5 = vmul.f32 %v2004_v59, %v813_v60  ;;  %v811_v56 = vmax.f32 %v775_v61, 0.0  ;;  %v854_v1 = vmax.f32 %v852_v53, %v853_v8 }
 0x1b5   : > { %v862_v54 = vrot.slane %v861_v38, 1 }
 0x1b6   : > { %v871_v13 = vmax.f32 %v830_v0, %v831_v5  ;;  %v829_v14 = vmul.f32 %v2004_v59, %v811_v56  ;;  %v855_v32 = vrot.slane %v854_v1, 1  ;;  %v932_v5 = vunpack.c.l.b16 %v893_v12 }
 0x1b7   : > { %v1230_v18 = vpop.f32.mrf.mxu0  ;;  %v863_v53 = vmax.f32 %v861_v38, %v862_v54 }
 0x1b8   : > { %v872_v10 = vrot.slane %v871_v13, 4  ;;  %v864_v9 = vmax.f32 %v828_v11, %v829_v14  ;;  %v796_v17 = vadd.f32 %v1230_v18, %v1994_v19  ;;  %v856_v46 = vmax.f32 %v854_v1, %v855_v32 }
 0x1b9   : > { %v787_v2 = vpop.f32.mrf.mxu0  ;;  %v895_v56 = vpack.c.bf16 %v863_v53, %v863_v53 }
 0x1ba   : > { %v865_v21 = vrot.slane %v864_v9, 4  ;;  %v873_v24 = vmax.f32 %v871_v13, %v872_v10  ;;  %v788_v25 = vadd.f32 %v1994_v19, %v787_v2  ;;  %v816_v27 = vmax.f32 %v796_v17, 0.0 }
 0x1bb   : > { %v1231_v58 = vpop.f32.mrf.mxu0  ;;  %v894_v47 = vpack.c.bf16 %v856_v46, %v856_v46  ;;  %v940_v13 = vsel %vm939_vm8, %v932_v5, %v931_v62  ;;  %v934_v10 = vunpack.c.l.b16 %v895_v56 }
 0x1bc   : > { %v866_v26 = vmax.f32 %v864_v9, %v865_v21  ;;  %v799_v29 = vadd.f32 %v1231_v58, %v1994_v19  ;;  %v814_v34 = vmax.f32 %v788_v25, 0.0  ;;  %v874_v39 = vrot.slane %v873_v24, 2 }
 0x1bd   : > { %v790_v20 = vpop.f32.mrf.mxu0  ;;  %v834_v45 = vmul.f32 %v2012_v31, %v816_v27  ;;  %v933_v63 = vunpack.c.l.b16 %v894_v47 }
 0x1be   : > { %v867_v33 = vrot.slane %v866_v26, 2  ;;  %v791_v36 = vadd.f32 %v1994_v19, %v790_v20  ;;  %v817_v41 = vmax.f32 %v799_v29, 0.0  ;;  %v832_v50 = vmul.f32 %v2012_v31, %v814_v34  ;;  %v1161_v29 = vld [vmem:[%s2099_s6] ss:$0 sm:$0xff] }
 0x1bf   : > { %v875_v19 = vmax.f32 %v873_v24, %v874_v39  ;;  %v942_v18 = vsel %vm941_vm9, %v933_v63, %v940_v13 }
 0x1c0   : > { %v868_v42 = vmax.f32 %v866_v26, %v867_v33  ;;  %v815_v43 = vmax.f32 %v791_v36, 0.0  ;;  %v835_v37 = vmul.f32 %v2004_v59, %v817_v41  ;;  %v944_v1 = vsel %vm943_vm10, %v934_v10, %v942_v18 }
 0x1c1   : > { %v876_v57 = vrot.slane %v875_v19, 1 }
 0x1c2   : > { %v869_v40 = vrot.slane %v868_v42, 1  ;;  %v833_v51 = vmul.f32 %v2004_v59, %v815_v43  ;;  %v885_v28 = vmax.f32 %v834_v45, %v835_v37 }
 0x1c3   : > { %v877_v7 = vmax.f32 %v875_v19, %v876_v57 }
 0x1c4   : > { %v878_v23 = vmax.f32 %v832_v50, %v833_v51  ;;  %v886_v30 = vrot.slane %v885_v28, 4  ;;  %v870_v49 = vmax.f32 %v868_v42, %v869_v40 }
 0x1c5   : > { %v897_v9 = vpack.c.bf16 %v877_v7, %v877_v7 }
 0x1c6   : > { %v879_v48 = vrot.slane %v878_v23, 4  ;;  %v887_v60 = vmax.f32 %v885_v28, %v886_v30  ;;  %v896_v59 = vpack.c.bf16 %v870_v49, %v870_v49 }
 0x1c7   : > { %v936_v22 = vunpack.c.l.b16 %v897_v9 }
 0x1c8   : > { %v880_v61 = vmax.f32 %v878_v23, %v879_v48  ;;  %v888_v31 = vrot.slane %v887_v60, 2  ;;  %v935_v15 = vunpack.c.l.b16 %v896_v59 }
 0x1ca   : > { %v881_v0 = vrot.slane %v880_v61, 2  ;;  %v889_v8 = vmax.f32 %v887_v60, %v888_v31  ;;  %v946_v3 = vsel %vm945_vm11, %v935_v15, %v944_v1 }
 0x1cb   : > { %v948_v58 = vsel %vm947_vm12, %v936_v22, %v946_v3 }
 0x1cc   : > { %v882_v11 = vmax.f32 %v880_v61, %v881_v0  ;;  %v890_v14 = vrot.slane %v889_v8, 1 }
 0x1ce   : > { %v883_v16 = vrot.slane %v882_v11, 1  ;;  %v891_v4 = vmax.f32 %v889_v8, %v890_v14 }
 0x1d0   : > { %v884_v17 = vmax.f32 %v882_v11, %v883_v16  ;;  %v899_v2 = vpack.c.bf16 %v891_v4, %v891_v4 }
 0x1d2   : > { %v898_v21 = vpack.c.bf16 %v884_v17, %v884_v17  ;;  %v938_v25 = vunpack.c.l.b16 %v899_v2 }
 0x1d4   : > { %v937_v24 = vunpack.c.l.b16 %v898_v21 }
 0x1d6   : > { %v950_v26 = vsel %vm949_vm13, %v937_v24, %v948_v58 }
 0x1d7   : > { %v952_v6 = vsel %vm951_vm14, %v938_v25, %v950_v26 }
 0x1d8   : > { %v953_v27 = vpack.c.b16 %v952_v6, %v952_v6 }
 0x1da   : > { %1249 = vmatmul.mubr.bf16.vlgmr.msra.gmra.mxu1 %v953_v27 }
 0x29a   : > { %v1037_v20 = vpop.f32.mrf.mxu1 }
 0x29b   : > { %v1038_v32 = vadd.f32 %v1161_v29, %v1037_v20 }
 0x29c   : > { %v1250_v33 = vpop.f32.mrf.mxu1 }
 0x29d   : > { %1043 = vst [vmem:[%s225_s28] sm:$0xff] %v1038_v32 }
 0x29e   : > { %v1040_v34 = vpop.f32.mrf.mxu1 }
 0x29f   : > { %1513 = shalt.err (!%p1510_p6)
}
 0x2a0   : > { %s1514_s27 = scalar_lea.hbm %s2048_s22, 128  ;;  %s1518_s10 = scalar_lea.hbm %s2100_s7, 256 }
 0x2a1   : > { %p1515_p7 = scmp.ne.s32.totalorder %s2048_s22, %s1514_s27  ;;  %p1519_p12 = scmp.lt.s32.totalorder %s2048_s22, %s2100_s7 }
 0x2a2   : > { %p1520_p11 = scmp.lt.s32.totalorder %s1518_s10, %s1514_s27 }
 0x2a3   : > { %p1516_p8 = pnand %p1515_p7, %p1677_p10 }
 0x2a4   : > { %p1521_p13 = por %p1520_p11, %p1519_p12 }
 0x2a5   : > { %p1517_p9 = pneg %p1516_p8 }
 0x2a7   : > { %p1522_p0 = pnand %p1521_p13, %p1517_p9 }
 0x2a9   : > { %1525 = shalt.err (!%p1522_p0)
}
 0x2aa   : > { %1256 = dma.vmem_to_hbm [thread:$0]  (%p1677_p10), %s2050_s18, 128, %s2048_s22, %s1045_s23   ;;  %v1251_v36 = vpop.f32.mrf.mxu1 }
 0x2ab PF: > { %p1268_p1 = scmp.ge.s32.totalorder %s1576_s8, 2  ;;  %s1070_s17 = sand.u32 1, %s1564_s29  }
 0x2ac   : > { %p2104_p2 = scmp.ne.s32.totalorder %s2102_s16, 0  ;;  %s1071_s20 = scalar_lea.sflag [#allocation8], %s1070_s17 }
 0x2ae   : > { %p1263_p3 = pnand %p1268_p1, %p2104_p2 }
 0x2b0   : > { %p1264_p4 = pneg %p1263_p3 }
 0x2b2   : > { %1559 = dma.done.wait (%p1264_p4), %s1071_s20, 128  }
 0x2b3   : > { %1561 = vsyncadd (%p1264_p4), %s1071_s20, 4294967168  ;;  %p24_p5 = scmp.ge.s32.totalorder %s1664_s11, 4   ;;  %s2105_s29 = smov %s1568_s30 }
 0x2b4   : > { %s2106_s30 = smov %s1572_s0  ;;  %s2107_s0 = smov %s1675_s14 }
 0x2b5   : > { %s2108_s8 = smov %s1664_s11  ;;  %26 = sbr.rel (!%p24_p5) target bundleno = 19 (0x13), region = 155 }
 0x2ba   :  { %1076 = vsyncpa [#allocation7], 1 }
 0x2bb   :  { %1078 = vsyncpa [#allocation7 + $0x1], 1 }
 0x2bc   :  { %1079 = vsyncpa [#allocation8], 1 }
 0x2bd   :  { %1081 = vsyncpa [#allocation8 + $0x1], 1 }
 0x2be   :  { %1082 = vsyncmov [#allocation3] }
 0x2c1   :  { %s1083_s8 = vpop.sfrf %1082 }
 0x2c2   :  { %p1174_p10 = scmp.ne.s32.totalorder %s1083_s8, 0 }
 0x2c4   :  { %1087 = shalt.err (%p1174_p10)  }

</bundles_post_ra>
